<compile_context>
chip_gen: v7x
topology: tpu7x:2x2x1
jax: 0.10.0
libtpu: 0.0.40
codegen_flags: <defaults>
</compile_context>

<pallas_src>
import functools
import math

import jax
import jax.numpy as jnp
from jax.experimental import pallas as pl
from jax.experimental.pallas import tpu as pltpu


_LANE_CANDIDATES = (512, 256, 128)   # prefer a wide lane-dense last dim
_MAX_TILE_ROWS = 1024                # (1024, 512) f32 tile == 2 MiB / input / buffer


def _round_up(x, m):
    return ((x + m - 1) // m) * m


def _mse_accumulate(rec_ref, lab_ref, partial_ref, acc_ref):
    """Shared MSE accumulation: pure-VPU per step, one XLU reduce per chunk."""
    s = pl.program_id(1)

    @pl.when(s == 0)
    def _init():
        acc_ref[...] = jnp.zeros_like(acc_ref)

    d = rec_ref[...].astype(jnp.float32) - lab_ref[...].astype(jnp.float32)
    acc_ref[...] += d * d

    @pl.when(s == pl.num_programs(1) - 1)
    def _finalize():
        # Single cross-sublane reduce per chunk; keep lane partials in the output.
        part = jnp.sum(acc_ref[...], axis=0, keepdims=True)           # (1, lane)
        row = jax.lax.broadcasted_iota(jnp.int32, partial_ref.shape, 0)
        partial_ref[...] = jnp.where(row == 0, part, 0.0)             # (8, lane)


def _mse_only_kernel(rec_ref, lab_ref, partial_ref, acc_ref):
    _mse_accumulate(rec_ref, lab_ref, partial_ref, acc_ref)


def _mse_kld_kernel(rec_ref, lab_ref, mu_ref, lv_ref,
                    partial_ref, kld_ref, acc_ref, *, inv_batch):
    _mse_accumulate(rec_ref, lab_ref, partial_ref, acc_ref)

    @pl.when(pl.program_id(1) == pl.num_programs(1) - 1)
    def _kld():
        mu = mu_ref[...].astype(jnp.float32)
        lv = lv_ref[...].astype(jnp.float32)
        # Single fused reduction: -0.5/B * sum(1 + lv - mu^2 - exp(lv))
        kld = (-0.5 * inv_batch) * jnp.sum(1.0 + lv - mu * mu - jnp.exp(lv))
        kld_ref[...] = jnp.broadcast_to(kld, kld_ref.shape)


def combined_loss(reconstructed, label, mu, log_var, weight_factor,
                  return_sep=False):
    """Pallas implementation of Combined_Loss.forward."""
    assert reconstructed.shape == label.shape
    total = int(math.prod(reconstructed.shape))
    weight = float(weight_factor)

    # ---- static tiling parameters (trace time) -------------------------------
    lane = next((c for c in _LANE_CANDIDATES if total % c == 0),
                _LANE_CANDIDATES[0])
    rows = -(-total // lane)
    tile_rows = min(_MAX_TILE_ROWS, _round_up(rows, 8))
    num_blocks = -(-rows // tile_rows)
    n_par = 2 if num_blocks >= 2 else 1          # shard across v7x's two TCs
    num_blocks = _round_up(num_blocks, n_par)
    n_seq = num_blocks // n_par
    rows_padded = num_blocks * tile_rows
    padded_total = rows_padded * lane

    # ---- lane-dense 2D slabs (zero padding contributes 0 to sum((r-l)^2)) ----
    rec_flat = reconstructed.reshape(-1)
    lab_flat = label.reshape(-1)
    if padded_total != total:
        rec_flat = jnp.pad(rec_flat, (0, padded_total - total))
        lab_flat = jnp.pad(lab_flat, (0, padded_total - total))
    rec2d = rec_flat.reshape(rows_padded, lane)
    lab2d = lab_flat.reshape(rows_padded, lane)

    # VMEM budget: 2 inputs x 2 buffers + tile-sized accumulator + margin.
    tile_bytes = tile_rows * lane * 4
    vmem_limit = int(min(max(5 * tile_bytes + (2 << 20), 4 << 20), 96 << 20))

    grid = (n_par, n_seq)
    data_spec = pl.BlockSpec((tile_rows, lane),
                             lambda p, s: (p * n_seq + s, 0))
    partial_spec = pl.BlockSpec((8, lane), lambda p, s: (p, 0))
    partial_shape = jax.ShapeDtypeStruct((n_par * 8, lane), jnp.float32)
    scratch = [pltpu.VMEM((tile_rows, lane), jnp.float32)]
    cparams = pltpu.CompilerParams(
        dimension_semantics=("parallel", "arbitrary"),
        vmem_limit_bytes=vmem_limit)

    if weight:
        batch = int(mu.shape[0])
        kernel = functools.partial(_mse_kld_kernel, inv_batch=1.0 / batch)
        partials, kld_out = pl.pallas_call(
            kernel,
            grid=grid,
            out_shape=(partial_shape,
                       jax.ShapeDtypeStruct((n_par * 8, 128), jnp.float32)),
            in_specs=[data_spec, data_spec,
                      pl.BlockSpec(tuple(mu.shape), lambda p, s: (0, 0)),
                      pl.BlockSpec(tuple(log_var.shape), lambda p, s: (0, 0))],
            out_specs=(partial_spec,
                       pl.BlockSpec((8, 128), lambda p, s: (p, 0))),
            scratch_shapes=scratch,
            compiler_params=cparams,
        )(rec2d, lab2d, mu, log_var)
        kld = kld_out[0, 0]
    else:
        # weight falsy: skip mu/log_var DMAs and the KLD entirely.
        partials = pl.pallas_call(
            _mse_only_kernel,
            grid=grid,
            out_shape=partial_shape,
            in_specs=[data_spec, data_spec],
            out_specs=partial_spec,
            scratch_shapes=scratch,
            compiler_params=cparams,
        )(rec2d, lab2d)
        kld = jnp.float32(0.0)

    # Tiny final combine in the wrapper (partials are (n_par*8, lane) f32).
    mse = jnp.sum(partials) * (1.0 / float(total))
    total_loss = mse + weight * kld
    if return_sep:
        return total_loss, [mse, kld]
    return total_loss


def _reference(reconstructed, label, mu, log_var, weight):
    ref_mse = jnp.mean((reconstructed - label) ** 2)
    ref_kld = jnp.mean(
        -0.5 * jnp.sum(1.0 + log_var - mu ** 2 - jnp.exp(log_var), axis=1))
    if not weight:
        ref_kld = jnp.float32(0.0)
    return ref_mse + weight * ref_kld, ref_mse, ref_kld


if __name__ == "__main__":
    key = jax.random.PRNGKey(0)
    k1, k2, k3, k4 = jax.random.split(key, 4)

    # Small shapes consistent with a VAE forward: images NCHW, latents (B, D).
    B, C, H, W = 2, 4, 16, 16
    D = 32
    reconstructed = jax.random.normal(k1, (B, C, H, W), dtype=jnp.float32)
    label = jax.random.normal(k2, (B, C, H, W), dtype=jnp.float32)
    mu = 0.1 * jax.random.normal(k3, (B, D), dtype=jnp.float32)
    log_var = 0.1 * jax.random.normal(k4, (B, D), dtype=jnp.float32)

    weight_factor = 0.5

    # --- primary check: small shape, weighted KLD ---
    total, (mse, kld) = combined_loss(reconstructed, label, mu, log_var,
                                      weight_factor, return_sep=True)
    jax.block_until_ready((total, mse, kld))
    ref_total, ref_mse, ref_kld = _reference(reconstructed, label, mu, log_var,
                                             weight_factor)
    assert jnp.allclose(total, ref_total, rtol=1e-5, atol=1e-5)
    assert jnp.allclose(mse, ref_mse, rtol=1e-5, atol=1e-5)
    assert jnp.allclose(kld, ref_kld, rtol=1e-5, atol=1e-5)

    # --- weight = 0 path (mu/log_var skipped entirely) ---
    total0, (mse0, kld0) = combined_loss(reconstructed, label, mu, log_var,
                                         0.0, return_sep=True)
    jax.block_until_ready(total0)
    assert jnp.allclose(total0, ref_mse, rtol=1e-5, atol=1e-5)
    assert jnp.allclose(kld0, 0.0)

    # --- larger shape to exercise the tiled (P=2, S=2) accumulation path ---
    Hb, Wb = 512, 512
    rec_b = jax.random.normal(k1, (B, C, Hb, Wb), dtype=jnp.float32)
    lab_b = jax.random.normal(k2, (B, C, Hb, Wb), dtype=jnp.float32)
    total_b, (mse_b, kld_b) = combined_loss(rec_b, lab_b, mu, log_var,
                                            weight_factor, return_sep=True)
    jax.block_until_ready((total_b, mse_b, kld_b))
    ref_total_b, ref_mse_b, ref_kld_b = _reference(rec_b, lab_b, mu, log_var,
                                                   weight_factor)
    assert jnp.allclose(total_b, ref_total_b, rtol=1e-4, atol=1e-5)
    assert jnp.allclose(mse_b, ref_mse_b, rtol=1e-4, atol=1e-5)
    assert jnp.allclose(kld_b, ref_kld_b, rtol=1e-5, atol=1e-5)

    print("KERNEL_OK")
</pallas_src>

<mosaic_0001>
module attributes {stable_mosaic.version = 11 : i64} {
  func.func @_mse_kld_kernel(%arg0: i32, %arg1: i32, %arg2: memref<8x512xf32, #tpu.memory_space<vmem>>, %arg3: memref<8x512xf32, #tpu.memory_space<vmem>>, %arg4: memref<2x32xf32, #tpu.memory_space<vmem>>, %arg5: memref<2x32xf32, #tpu.memory_space<vmem>>, %arg6: memref<8x512xf32, #tpu.memory_space<vmem>>, %arg7: memref<8x128xf32, #tpu.memory_space<vmem>>, %arg8: memref<8x512xf32, #tpu.memory_space<vmem>>) attributes {dimension_semantics = [#tpu.dimension_semantics<parallel>, #tpu.dimension_semantics<arbitrary>], iteration_bounds = array<i64: 1, 1>, scalar_prefetch = 0 : i64, scratch_operands = 1 : i64, tpu.core_type = #tpu.core_type<tc>, window_params = [{transform_indices = @transform_0, window_bounds = array<i64: 8, 512>}, {transform_indices = @transform_1, window_bounds = array<i64: 8, 512>}, {pipeline_mode = #tpu.pipeline_mode<synchronous>, transform_indices = @transform_2, window_bounds = array<i64: 2, 32>}, {pipeline_mode = #tpu.pipeline_mode<synchronous>, transform_indices = @transform_3, window_bounds = array<i64: 2, 32>}, {transform_indices = @transform_4, window_bounds = array<i64: 8, 512>}, {transform_indices = @transform_5, window_bounds = array<i64: 8, 128>}]} {
    %c0_i32 = arith.constant 0 : i32
    %0 = arith.cmpi eq, %arg1, %c0_i32 : i32
    %1 = arith.extui %0 : i1 to i32
    %c0_i32_0 = arith.constant 0 : i32
    %2 = arith.cmpi ne, %1, %c0_i32_0 : i32
    scf.if %2 {
      %cst = arith.constant 0.000000e+00 : f32
      %16 = vector.broadcast %cst : f32 to vector<8x512xf32>
      %c0_12 = arith.constant 0 : index
      %c0_13 = arith.constant 0 : index
      %17 = vector.load %arg8[%c0_12, %c0_13] : memref<8x512xf32, #tpu.memory_space<vmem>>, vector<8x512xf32>
      tpu.vector_store %arg8[%c0_12, %c0_13], %16 {strides = array<i32>} : memref<8x512xf32, #tpu.memory_space<vmem>>, vector<8x512xf32>,
    } else {
    }
    %c0 = arith.constant 0 : index
    %c0_1 = arith.constant 0 : index
    %3 = vector.load %arg2[%c0, %c0_1] : memref<8x512xf32, #tpu.memory_space<vmem>>, vector<8x512xf32>
    %c0_2 = arith.constant 0 : index
    %c0_3 = arith.constant 0 : index
    %4 = vector.load %arg3[%c0_2, %c0_3] : memref<8x512xf32, #tpu.memory_space<vmem>>, vector<8x512xf32>
    %5 = arith.subf %3, %4 : vector<8x512xf32>
    %c0_4 = arith.constant 0 : index
    %c0_5 = arith.constant 0 : index
    %6 = vector.load %arg8[%c0_4, %c0_5] : memref<8x512xf32, #tpu.memory_space<vmem>>, vector<8x512xf32>
    %7 = arith.mulf %5, %5 : vector<8x512xf32>
    %8 = arith.addf %6, %7 : vector<8x512xf32>
    %c0_6 = arith.constant 0 : index
    %c0_7 = arith.constant 0 : index
    %9 = vector.load %arg8[%c0_6, %c0_7] : memref<8x512xf32, #tpu.memory_space<vmem>>, vector<8x512xf32>
    tpu.vector_store %arg8[%c0_6, %c0_7], %8 {strides = array<i32>} : memref<8x512xf32, #tpu.memory_space<vmem>>, vector<8x512xf32>,
    %c0_i32_8 = arith.constant 0 : i32
    %10 = arith.cmpi eq, %arg1, %c0_i32_8 : i32
    %11 = arith.extui %10 : i1 to i32
    %c0_i32_9 = arith.constant 0 : i32
    %12 = arith.cmpi ne, %11, %c0_i32_9 : i32
    scf.if %12 {
      %c0_12 = arith.constant 0 : index
      %c0_13 = arith.constant 0 : index
      %16 = vector.load %arg8[%c0_12, %c0_13] : memref<8x512xf32, #tpu.memory_space<vmem>>, vector<8x512xf32>
      %cst = arith.constant dense<0.000000e+00> : vector<512xf32>
      %17 = vector.multi_reduction <add>, %16, %cst [0] : vector<8x512xf32> to vector<512xf32>
      %18 = vector.shape_cast %17 : vector<512xf32> to vector<1x512xf32>
      %19 = tpu.iota {dimensions = array<i32: 0>} : vector<8x512xi32>
      %c0_i32_14 = arith.constant 0 : i32
      %20 = vector.broadcast %c0_i32_14 : i32 to vector<8x512xi32>
      %21 = arith.cmpi eq, %19, %20 : vector<8x512xi32>
      %cst_15 = arith.constant 0.000000e+00 : f32
      %22 = vector.shape_cast %18 : vector<1x512xf32> to vector<1x512xf32>
      %23 = vector.broadcast %22 : vector<1x512xf32> to vector<8x512xf32>
      %24 = vector.broadcast %cst_15 : f32 to vector<8x512xf32>
      %25 = arith.select %21, %23, %24 : vector<8x512xi1>, vector<8x512xf32>
      %c0_16 = arith.constant 0 : index
      %c0_17 = arith.constant 0 : index
      %26 = vector.load %arg6[%c0_16, %c0_17] : memref<8x512xf32, #tpu.memory_space<vmem>>, vector<8x512xf32>
      tpu.vector_store %arg6[%c0_16, %c0_17], %25 {strides = array<i32>} : memref<8x512xf32, #tpu.memory_space<vmem>>, vector<8x512xf32>,
    } else {
    }
    %c0_i32_10 = arith.constant 0 : i32
    %13 = arith.cmpi eq, %arg1, %c0_i32_10 : i32
    %14 = arith.extui %13 : i1 to i32
    %c0_i32_11 = arith.constant 0 : i32
    %15 = arith.cmpi ne, %14, %c0_i32_11 : i32
    scf.if %15 {
      %c0_12 = arith.constant 0 : index
      %c0_13 = arith.constant 0 : index
      %16 = vector.load %arg4[%c0_12, %c0_13] : memref<2x32xf32, #tpu.memory_space<vmem>>, vector<2x32xf32>
      %c0_14 = arith.constant 0 : index
      %c0_15 = arith.constant 0 : index
      %17 = vector.load %arg5[%c0_14, %c0_15] : memref<2x32xf32, #tpu.memory_space<vmem>>, vector<2x32xf32>
      %cst = arith.constant 1.000000e+00 : f32
      %18 = vector.broadcast %cst : f32 to vector<2x32xf32>
      %19 = arith.addf %18, %17 : vector<2x32xf32>
      %20 = arith.mulf %16, %16 : vector<2x32xf32>
      %21 = arith.subf %19, %20 : vector<2x32xf32>
      %22 = math.exp %17 : vector<2x32xf32>
      %23 = arith.subf %21, %22 : vector<2x32xf32>
      %24 = vector.shape_cast %23 : vector<2x32xf32> to vector<1x2x32xf32>
      %cst_16 = arith.constant dense<0.000000e+00> : vector<1xf32>
      %25 = vector.multi_reduction <add>, %24, %cst_16 [1, 2] : vector<1x2x32xf32> to vector<1xf32>
      %26 = vector.shape_cast %25 : vector<1xf32> to vector<1x1x1xf32>
      %27 = vector.extract %26[0, 0, 0] : f32 from vector<1x1x1xf32>
      %cst_17 = arith.constant -2.500000e-01 : f32
      %28 = arith.mulf %cst_17, %27 : f32
      %29 = vector.broadcast %28 : f32 to vector<8x128xf32>
      %c0_18 = arith.constant 0 : index
      %c0_19 = arith.constant 0 : index
      %30 = vector.load %arg7[%c0_18, %c0_19] : memref<8x128xf32, #tpu.memory_space<vmem>>, vector<8x128xf32>
      tpu.vector_store %arg7[%c0_18, %c0_19], %29 {strides = array<i32>} : memref<8x128xf32, #tpu.memory_space<vmem>>, vector<8x128xf32>,
    } else {
    }
    return
  }
  func.func @transform_0(%arg0: i32, %arg1: i32) -> (i32, i32) {
    %c1_i32 = arith.constant 1 : i32
    %0 = arith.muli %arg0, %c1_i32 : i32
    %1 = arith.addi %0, %arg1 : i32
    %c0_i32 = arith.constant 0 : i32
    %c0_i32_0 = arith.constant 0 : i32
    return %1, %c0_i32 : i32, i32
  }
  func.func @transform_1(%arg0: i32, %arg1: i32) -> (i32, i32) {
    %c1_i32 = arith.constant 1 : i32
    %0 = arith.muli %arg0, %c1_i32 : i32
    %1 = arith.addi %0, %arg1 : i32
    %c0_i32 = arith.constant 0 : i32
    %c0_i32_0 = arith.constant 0 : i32
    return %1, %c0_i32 : i32, i32
  }
  func.func @transform_2(%arg0: i32, %arg1: i32) -> (i32, i32) {
    %c0_i32 = arith.constant 0 : i32
    %c0_i32_0 = arith.constant 0 : i32
    %c0_i32_1 = arith.constant 0 : i32
    return %c0_i32, %c0_i32_0 : i32, i32
  }
  func.func @transform_3(%arg0: i32, %arg1: i32) -> (i32, i32) {
    %c0_i32 = arith.constant 0 : i32
    %c0_i32_0 = arith.constant 0 : i32
    %c0_i32_1 = arith.constant 0 : i32
    return %c0_i32, %c0_i32_0 : i32, i32
  }
  func.func @transform_4(%arg0: i32, %arg1: i32) -> (i32, i32) {
    %c0_i32 = arith.constant 0 : i32
    %c0_i32_0 = arith.constant 0 : i32
    return %arg0, %c0_i32 : i32, i32
  }
  func.func @transform_5(%arg0: i32, %arg1: i32) -> (i32, i32) {
    %c0_i32 = arith.constant 0 : i32
    %c0_i32_0 = arith.constant 0 : i32
    return %arg0, %c0_i32 : i32, i32
  }
}

</mosaic_0001>

<bundles_post_ra>
// kernel: tpu_custom_call.1
= control target key start
LH: loop header
LB: loop body
LE: loop exit
PB: predicated region body
PF: predicated region fallthrough
CT: control target
= control target key end

     0   :  { %11 = vsyncpa [#allocation4], 0  ;;  %s377_s0 = inlined_call_operand.hbm [shape: f32[8,512], index: 0, kind: input, shape index: {}]   ;;  %s378_s1 = inlined_call_operand.hbm [shape: f32[8,512], index: 1, kind: input, shape index: {}]   ;;  %s379_s2 = inlined_call_operand.vmem [shape: f32[2,32], index: 2, kind: input, shape index: {}]   ;;  %s380_s3 = inlined_call_operand.vmem [shape: f32[2,32], index: 3, kind: input, shape index: {}]   ;;  %s381_s4 = inlined_call_operand.hbm [shape: f32[8,512], index: 4, kind: output, shape index: {0}]   ;;  %s382_s5 = inlined_call_operand.hbm [shape: f32[8,128], index: 5, kind: output, shape index: {1}]  }
   0x1   :  { %12 = vsyncpa [#allocation7], 0 }
   0x2   :  { %13 = vsyncpa [#allocation5], 0 }
   0x3   :  { %14 = vsyncpa [#allocation10], 0  ;;  %s289_s18 = smov [#allocation3]   ;;  %s290_s20 = smov [#allocation6]  }
   0x4   :  { %s25_s19 = sshll.u32 %s289_s18, 4  ;;  %s39_s21 = sshll.u32 %s290_s20, 4  ;;  %s26_s19 = int_to_ptr.vmem [resolvable:$true] %s25_s19  ;;  %s40_s21 = int_to_ptr.vmem [resolvable:$true] %s39_s21 }
   0x5   :  { %s193_s24 = scalar_lea.hbm %s377_s0, 512 }
   0x6   :  { %p194_p0 = scmp.ne.s32.totalorder %s377_s0, %s193_s24  ;;  %p197_p1 = scmp.lt.u32.totalorder %s193_s24, %s377_s0 }
   0x8   :  { %p199_p2 = pnand %p197_p1, %p194_p0 }
   0xa   :  { %202 = shalt.err (!%p199_p2)
}
   0xb   :  { %s203_s29 = scalar_lea.vmem %s26_s19, 512  ;;  %p208_p4 = scmp.lt.s32.totalorder %s26_s19, %s26_s19 }
   0xc   :  { %p204_p3 = scmp.ne.s32.totalorder %s26_s19, %s203_s29  ;;  %p209_p5 = scmp.lt.s32.totalorder %s203_s29, %s203_s29 }
   0xe   :  { %p210_p6 = por %p209_p5, %p208_p4 }
  0x10   :  { %p211_p7 = pnand %p210_p6, %p204_p3 }
  0x12   :  { %214 = shalt.err (!%p211_p7)
}
  0x13   :  { %28 = dma.hbm_to_vmem [thread:$0]  %s377_s0, 512, %s26_s19, [#allocation4]  }
  0x14   :  { %s215_s9 = scalar_lea.hbm %s378_s1, 512 }
  0x15   :  { %p216_p8 = scmp.ne.s32.totalorder %s378_s1, %s215_s9  ;;  %p219_p9 = scmp.lt.u32.totalorder %s215_s9, %s378_s1 }
  0x17   :  { %p221_p10 = pnand %p219_p9, %p216_p8 }
  0x19   :  { %224 = shalt.err (!%p221_p10)
}
  0x1a   :  { %s225_s14 = scalar_lea.vmem %s40_s21, 512  ;;  %p230_p12 = scmp.lt.s32.totalorder %s40_s21, %s40_s21 }
  0x1b   :  { %p226_p11 = scmp.ne.s32.totalorder %s40_s21, %s225_s14  ;;  %p231_p13 = scmp.lt.s32.totalorder %s225_s14, %s225_s14 }
  0x1d   :  { %p232_p0 = por %p231_p13, %p230_p12 }
  0x1f   :  { %p233_p1 = pnand %p232_p0, %p226_p11 }
  0x21   :  { %236 = shalt.err (!%p233_p1)
}
  0x22   :  { %42 = dma.hbm_to_vmem [thread:$0]  %s378_s1, 512, %s40_s21, [#allocation7]  }
  0x23   :  { %281 = dma.done.wait [#allocation4], 512  }
  0x24   :  { %282 = vsyncadd [#allocation4], 4294966784 }
  0x25   :  { %283 = dma.done.wait [#allocation7], 512  }
  0x26   :  { %284 = vsyncadd [#allocation7], 4294966784  ;;  %v134_v0 = vld [vmem:[%s380_s3] sm:$0x3]  ;;  %vm141_vm0 = vcmask 254976   ;;  %v64_v10 = vld [vmem:[#allocation3 + $0x8] sm:$0xff]  ;;  %v122_v39 = vlaneseq }
  0x27   :  { %v138_v1 = vmul.f32 1.442695, %v134_v0  ;;  %v133_v2 = vld [vmem:[%s379_s2] sm:$0x3]  ;;  %v135_v3 = vadd.f32 1.0, %v134_v0  ;;  %v65_v11 = vld [vmem:[#allocation3 + $0x10] sm:$0xff] }
  0x28   :  { %v136_v4 = vmul.f32 %v133_v2, %v133_v2  ;;  %v63_v9 = vld [vmem:[#allocation3] sm:$0xff]  ;;  %v66_v12 = vld [vmem:[#allocation3 + $0x18] sm:$0xff]  ;;  %v68_v14 = vld [vmem:[#allocation6 + $0x8] sm:$0xff]  ;;  %v123_v44 = vshrl.u32 %v122_v39, 7  ;;  %s291_s1 = smov [#allocation8]  }
  0x29   :  { %191 = vpow2.f32 %v138_v1  ;;  %v67_v13 = vld [vmem:[#allocation6] sm:$0xff]  ;;  %v69_v15 = vld [vmem:[#allocation6 + $0x10] sm:$0xff]  ;;  %v70_v16 = vld [vmem:[#allocation6 + $0x18] sm:$0xff]  ;;  %v72_v18 = vsub.f32 %v64_v10, %v68_v14  ;;  %s161_s2 = sshll.u32 %s291_s1, 4  ;;  %s162_s2 = int_to_ptr.vmem [resolvable:$true] %s161_s2 }
  0x2a   :  { %v137_v5 = vsub.f32 %v135_v3, %v136_v4  ;;  %v71_v17 = vsub.f32 %v63_v9, %v67_v13  ;;  %v73_v19 = vsub.f32 %v65_v11, %v69_v15  ;;  %v74_v20 = vsub.f32 %v66_v12, %v70_v16  ;;  %s237_s3 = scalar_lea.vmem %s162_s2, 512  ;;  %p242_p3 = scmp.lt.s32.totalorder %s162_s2, %s162_s2 }
  0x2b   :  { %v80_v22 = vmul.f32 %v72_v18, %v72_v18  ;;  %vm124_vm1 = vcmp.eq.s32.totalorder %v123_v44, 0  ;;  %p238_p2 = scmp.ne.s32.totalorder %s162_s2, %s237_s3  ;;  %p243_p4 = scmp.lt.s32.totalorder %s237_s3, %s237_s3 }
  0x2c   :  { %v79_v21 = vmul.f32 %v71_v17, %v71_v17  ;;  %v81_v23 = vmul.f32 %v73_v19, %v73_v19  ;;  %v82_v24 = vmul.f32 %v74_v20, %v74_v20 }
  0x2d   :  { %v104_v26 = vrot.slane %v80_v22, 4  ;;  %p244_p5 = por %p243_p4, %p242_p3 }
  0x2e   :  { %v98_v25 = vrot.slane %v79_v21, 4  ;;  %v110_v27 = vrot.slane %v81_v23, 4  ;;  %v116_v28 = vrot.slane %v82_v24, 4 }
  0x2f   :  { %v105_v30 = vadd.f32 %v104_v26, %v80_v22  ;;  %p245_p6 = pnand %p244_p5, %p238_p2 }
  0x30   :  { %v99_v29 = vadd.f32 %v98_v25, %v79_v21  ;;  %v111_v31 = vadd.f32 %v110_v27, %v81_v23  ;;  %v117_v32 = vadd.f32 %v116_v28, %v82_v24 }
  0x31   :  { %v106_v34 = vrot.slane %v105_v30, 2 }
  0x32   :  { %v100_v33 = vrot.slane %v99_v29, 2  ;;  %v112_v35 = vrot.slane %v111_v31, 2  ;;  %v118_v36 = vrot.slane %v117_v32, 2 }
  0x33   :  { %v192_v6 = vpop.eup %191  ;;  %v107_v38 = vadd.f32 %v106_v34, %v105_v30 }
  0x34   :  { %v140_v7 = vsub.f32 %v137_v5, %v192_v6  ;;  %v101_v37 = vadd.f32 %v100_v33, %v99_v29  ;;  %v113_v40 = vadd.f32 %v112_v35, %v111_v31  ;;  %v119_v41 = vadd.f32 %v118_v36, %v117_v32 }
  0x35   :  { %v108_v43 = vrot.slane %v107_v38, 1 }
  0x36   :  { %v142_v8 = vsel %vm141_vm0, %v140_v7, 0.0  ;;  %v102_v42 = vrot.slane %v101_v37, 1  ;;  %v114_v45 = vrot.slane %v113_v40, 1  ;;  %v120_v46 = vrot.slane %v119_v41, 1 }
  0x37   :  { %143 = vadd.xlane.f32.xlu0 %v142_v8  ;;  %v109_v48 = vadd.f32 %v108_v43, %v107_v38 }
  0x38   :  { %v103_v47 = vadd.f32 %v102_v42, %v101_v37  ;;  %v115_v49 = vadd.f32 %v114_v45, %v113_v40  ;;  %v121_v50 = vadd.f32 %v120_v46, %v119_v41 }
  0x39   :  { %v126_v52 = vsel %vm124_vm1, %v109_v48, 0.0 }
  0x3a   :  { %v125_v51 = vsel %vm124_vm1, %v103_v47, 0.0  ;;  %v127_v53 = vsel %vm124_vm1, %v115_v49, 0.0  ;;  %v128_v54 = vsel %vm124_vm1, %v121_v50, 0.0  ;;  %130 = vst [vmem:[#allocation8 + $0x8] sm:$0xff] %v126_v52 }
  0x3b   :  { %129 = vst [vmem:[#allocation8] sm:$0xff] %v125_v51  ;;  %131 = vst [vmem:[#allocation8 + $0x10] sm:$0xff] %v127_v53 }
  0x3c   :  { %132 = vst [vmem:[#allocation8 + $0x18] sm:$0xff] %v128_v54 }
  0x3d   :  { %248 = shalt.err (!%p245_p6)
}
  0x3e   :  { %s249_s22 = scalar_lea.hbm %s381_s4, 512 }
  0x3f   :  { %p250_p7 = scmp.ne.s32.totalorder %s381_s4, %s249_s22  ;;  %p253_p8 = scmp.lt.u32.totalorder %s249_s22, %s381_s4 }
  0x41   :  { %p255_p9 = pnand %p253_p8, %p250_p7 }
  0x43   :  { %258 = shalt.err (!%p255_p9)
}
  0x44   :  { %164 = dma.vmem_to_hbm [thread:$0]  %s162_s2, 512, %s381_s4, [#allocation5]  }
  0x45   :  { %s292_s29 = smov [#allocation9]  }
  0x46   :  { %s171_s30 = sshll.u32 %s292_s29, 4  ;;  %s172_s30 = int_to_ptr.vmem [resolvable:$true] %s171_s30 }
  0x47   :  { %s259_s8 = scalar_lea.vmem %s172_s30, 128  ;;  %p264_p11 = scmp.lt.s32.totalorder %s172_s30, %s172_s30 }
  0x48   :  { %p260_p10 = scmp.ne.s32.totalorder %s172_s30, %s259_s8  ;;  %p265_p12 = scmp.lt.s32.totalorder %s259_s8, %s259_s8 }
  0x4a   :  { %p266_p13 = por %p265_p12, %p264_p11 }
  0x4c   :  { %p267_p0 = pnand %p266_p13, %p260_p10 }
  0xc4   :  { %v144_v55 = vpop.xlane.xlu0 %143 }
  0xc5   :  { %v145_v56 = vrot.slane %v144_v55, 4 }
  0xc7   :  { %v146_v57 = vadd.f32 %v145_v56, %v144_v55 }
  0xc9   :  { %v147_v58 = vrot.slane %v146_v57, 2 }
  0xcb   :  { %v148_v59 = vadd.f32 %v147_v58, %v146_v57 }
  0xcd   :  { %v149_v60 = vrot.slane %v148_v59, 1 }
  0xcf   :  { %v150_v61 = vadd.f32 %v149_v60, %v148_v59 }
  0xd1   :  { %185 = vpush %v150_v61 }
 0x102   :  { %s186_s6 = spop %185 }
 0x103   :  { %s152_s7 = smul.f32 -0.25, %s186_s6 }
 0x105   :  { %v153_v62 = vstv %s152_s7 }
 0x106   :  { %154 = vst [vmem:[#allocation9] sm:$0xff] %v153_v62 }
 0x107   :  { %270 = shalt.err (!%p267_p0)
}
 0x108   :  { %s271_s10 = scalar_lea.hbm %s382_s5, 128 }
 0x109   :  { %p272_p1 = scmp.ne.s32.totalorder %s382_s5, %s271_s10  ;;  %p275_p2 = scmp.lt.u32.totalorder %s271_s10, %s382_s5 }
 0x10b   :  { %p277_p3 = pnand %p275_p2, %p272_p1 }
 0x10d   :  { %280 = shalt.err (!%p277_p3)
}
 0x10e   :  { %174 = dma.vmem_to_hbm [thread:$0]  %s172_s30, 128, %s382_s5, [#allocation10]  }
 0x10f   :  { %285 = dma.done.wait [#allocation5], 512  }
 0x110   :  { %286 = vsyncadd [#allocation5], 4294966784 }
 0x111   :  { %287 = dma.done.wait [#allocation10], 128  }
 0x112   :  { %288 = vsyncadd [#allocation10], 4294967168 }
 0x113   :  { %181 = vsyncpa [#allocation4], 1 }
 0x114   :  { %182 = vsyncpa [#allocation7], 1 }
 0x115   :  { %183 = vsyncpa [#allocation5], 1 }
 0x116   :  { %184 = vsyncpa [#allocation10], 1 }

</bundles_post_ra>
